<compile_context>
chip_gen: v7x
topology: tpu7x:2x2x1
jax: 0.10.0
libtpu: 0.0.40
codegen_flags: <defaults>
</compile_context>

<pallas_src>
from functools import partial

import jax
import jax.numpy as jnp
from jax.experimental import pallas as pl
from jax.experimental.pallas import tpu as pltpu

NUM_NODES = 16          # N
NUM_FEATURES = 16       # F
HIDDEN = 64             # hidden_size from the PyTorch module
NUM_GRAPHS = 16         # graphs per batched call
GRAPHS_PER_BLOCK = 8    # graphs fused per grid step -> R = 8*16 = 128 rows/step


def gnn_kernel(a_ref, x_ref, w1_ref, b1_ref, w2_ref, b2_ref,
               wfct_ref, bfc_ref, out_ref):
    """One grid step == one block of graphs packed block-diagonally.

    a_ref : (1, R, R) bf16  block-diagonal normalized adjacency
    x_ref : (1, R, F) bf16  stacked node features
    out   : (1, 1, R) f32   lane-dense row of per-node fc outputs
    """
    a = a_ref[0]                                   # (R, R) bf16
    x = x_ref[0]                                   # (R, F) bf16

    # --- GCNConv 1: relu(A @ (X @ W1) + b1)  (X, W1 already bf16) ---
    xw1 = jnp.dot(x, w1_ref[...], preferred_element_type=jnp.float32)      # (R, H)
    h = jnp.dot(a, xw1.astype(jnp.bfloat16),
                preferred_element_type=jnp.float32) + b1_ref[...]          # (R, H)
    h = jnp.maximum(h, 0.0)

    # --- GCNConv 2: relu(A @ (H @ W2) + b2) ---
    hw2 = jnp.dot(h.astype(jnp.bfloat16), w2_ref[...],
                  preferred_element_type=jnp.float32)                      # (R, H)
    h2 = jnp.dot(a, hw2.astype(jnp.bfloat16),
                 preferred_element_type=jnp.float32) + b2_ref[...]         # (R, H)
    h2 = jnp.maximum(h2, 0.0)

    # --- fc: lane-dense (1, R) row:  Wfc^T @ H2^T + bfc ---
    h2t = jnp.transpose(h2).astype(jnp.bfloat16)                           # (H, R)
    y = jnp.dot(wfct_ref[...], h2t, preferred_element_type=jnp.float32)    # (1, R)
    out_ref[0] = y + bfc_ref[0]                                            # unmasked 128-lane store


def gcn_normalized_adjacency(edge_index, num_nodes):
    """Dense D^-1/2 (A + I) D^-1/2 matching PyG GCNConv (add_self_loops=True).

    Note: scatter-add means duplicate edges accumulate weight > 1 (same as
    PyG's default scatter behavior).
    """
    src, dst = edge_index[0], edge_index[1]
    a = jnp.zeros((num_nodes, num_nodes), jnp.float32)
    a = a.at[dst, src].add(1.0)                       # message flows src -> dst
    a = a + jnp.eye(num_nodes, dtype=jnp.float32)     # self loops
    deg = a.sum(axis=1)
    dinv = jnp.where(deg > 0, jax.lax.rsqrt(deg), 0.0)
    return dinv[:, None] * a * dinv[None, :]


@partial(jax.jit, static_argnames=("graphs_per_block",))
def gnn_forward_batched(params, x_batch, a_hat_batch, graphs_per_block=None):
    """Batched forward: x_batch (G,N,F), a_hat_batch (G,N,N) -> (G,N,1)."""
    g, n, f = x_batch.shape
    h = params["w1"].shape[1]
    if graphs_per_block is None:
        graphs_per_block = g
    assert g % graphs_per_block == 0
    num_blocks = g // graphs_per_block
    r = graphs_per_block * n                      # rows per grid step

    # --- pack each block of graphs into a block-diagonal adjacency + stacked X ---
    a_chunks = a_hat_batch.reshape(num_blocks, graphs_per_block, n, n)

    def block_diag(a_chunk):                      # (gpb, N, N) -> (R, R)
        out = jnp.zeros((r, r), a_chunk.dtype)
        for i in range(graphs_per_block):         # static unroll (gpb is small)
            out = jax.lax.dynamic_update_slice(out, a_chunk[i], (i * n, i * n))
        return out

    a_bd = jax.vmap(block_diag)(a_chunks).astype(jnp.bfloat16)   # (B, R, R)
    x_bd = x_batch.reshape(num_blocks, r, f).astype(jnp.bfloat16)  # (B, R, F)

    # bf16 MXU operands at the call boundary; biases stay f32.
    w1 = params["w1"].astype(jnp.bfloat16)
    w2 = params["w2"].astype(jnp.bfloat16)
    wfct = params["wfc"].reshape(1, h).astype(jnp.bfloat16)       # (1, H) lane-dense
    bfc = params["bfc"].reshape(1).astype(jnp.float32)            # scalar -> SMEM

    out = pl.pallas_call(
        gnn_kernel,
        out_shape=jax.ShapeDtypeStruct((num_blocks, 1, r), jnp.float32),
        grid=(num_blocks,),
        in_specs=[
            pl.BlockSpec((1, r, r), lambda i: (i, 0, 0)),        # block-diag A
            pl.BlockSpec((1, r, f), lambda i: (i, 0, 0)),        # stacked X
            pl.BlockSpec((f, h), lambda i: (0, 0)),              # W1 (resident)
            pl.BlockSpec((1, h), lambda i: (0, 0)),              # b1
            pl.BlockSpec((h, h), lambda i: (0, 0)),              # W2
            pl.BlockSpec((1, h), lambda i: (0, 0)),              # b2
            pl.BlockSpec((1, h), lambda i: (0, 0)),              # Wfc^T
            pl.BlockSpec(memory_space=pltpu.MemorySpace.SMEM),   # bfc scalar
        ],
        out_specs=pl.BlockSpec((1, 1, r), lambda i: (i, 0, 0)),  # lane-dense row
        compiler_params=pltpu.CompilerParams(
            dimension_semantics=("parallel",),   # 2 steps -> both v7x TCs busy
        ),
    )(a_bd, x_bd, w1, params["b1"], w2, params["b2"], wfct, bfc)

    # (B, 1, R) lane-dense rows -> (G, N, 1) to match the PyTorch module output.
    return out.reshape(g, n, 1)


def gnn_forward(params, x, edge_index):
    """Single-graph convenience wrapper matching GNNModel.forward(x, edge_index)."""
    a_hat = gcn_normalized_adjacency(edge_index, x.shape[0])
    return gnn_forward_batched(params, x[None], a_hat[None], graphs_per_block=1)[0]


def init_params(key, num_features, hidden):
    k1, k2, k3 = jax.random.split(key, 3)

    def glorot(k, shape):
        lim = jnp.sqrt(6.0 / (shape[0] + shape[1]))
        return jax.random.uniform(k, shape, jnp.float32, -lim, lim)

    return {
        "w1": glorot(k1, (num_features, hidden)),
        "b1": jnp.zeros((1, hidden), jnp.float32),
        "w2": glorot(k2, (hidden, hidden)),
        "b2": jnp.zeros((1, hidden), jnp.float32),
        "wfc": glorot(k3, (hidden, 1)),
        "bfc": jnp.zeros((1, 1), jnp.float32),
    }


if __name__ == "__main__":
    key = jax.random.PRNGKey(0)
    kx, kp = jax.random.split(key)

    # Deterministic batch of node-feature matrices.
    x_batch = jax.random.normal(
        kx, (NUM_GRAPHS, NUM_NODES, NUM_FEATURES), jnp.float32)

    # Per-graph undirected ring graphs (different strides per graph, no dups).
    def make_ring(shift):
        src = jnp.arange(NUM_NODES, dtype=jnp.int32)
        dst = (src + shift) % NUM_NODES
        return jnp.concatenate(
            [jnp.stack([src, dst]), jnp.stack([dst, src])], axis=1)

    edge_index_batch = jnp.stack(
        [make_ring(1 + (g % 3)) for g in range(NUM_GRAPHS)])

    a_hat_batch = jax.vmap(
        lambda ei: gcn_normalized_adjacency(ei, NUM_NODES))(edge_index_batch)

    params = init_params(kp, NUM_FEATURES, HIDDEN)

    # Batched forward: block-diag fused, grid=(2,), 128-row MXU tiles per step.
    out = gnn_forward_batched(
        params, x_batch, a_hat_batch, graphs_per_block=GRAPHS_PER_BLOCK)
    jax.block_until_ready(out)
    assert out.shape == (NUM_GRAPHS, NUM_NODES, 1) and out.dtype == jnp.float32

    # Single-graph path matching the original module interface.
    out_single = gnn_forward(params, x_batch[0], edge_index_batch[0])
    jax.block_until_ready(out_single)
    assert out_single.shape == (NUM_NODES, 1)

    # Cross-check against a pure-JAX f32 reference (bf16-matmul tolerance).
    def ref_forward(a, x):
        h = jnp.maximum(a @ (x @ params["w1"]) + params["b1"], 0.0)
        h = jnp.maximum(a @ (h @ params["w2"]) + params["b2"], 0.0)
        return h @ params["wfc"] + params["bfc"]

    ref = jax.vmap(ref_forward)(a_hat_batch, x_batch)
    max_err = float(jnp.max(jnp.abs(out - ref)))
    tol = 5e-2 * (1.0 + float(jnp.max(jnp.abs(ref))))
    assert max_err < tol, (max_err, tol)

    max_err_single = float(jnp.max(jnp.abs(out_single - ref[0])))
    assert max_err_single < tol, (max_err_single, tol)

    print("KERNEL_OK")
</pallas_src>

<mosaic_0001>
module attributes {stable_mosaic.version = 11 : i64} {
  func.func @gnn_kernel(%arg0: i32, %arg1: memref<1x128x128xbf16, #tpu.memory_space<vmem>>, %arg2: memref<1x128x16xbf16, #tpu.memory_space<vmem>>, %arg3: memref<16x64xbf16, #tpu.memory_space<vmem>>, %arg4: memref<1x64xf32, #tpu.memory_space<vmem>>, %arg5: memref<64x64xbf16, #tpu.memory_space<vmem>>, %arg6: memref<1x64xf32, #tpu.memory_space<vmem>>, %arg7: memref<1x64xbf16, #tpu.memory_space<vmem>>, %arg8: memref<1xf32, #tpu.memory_space<smem>>, %arg9: memref<1x1x128xf32, #tpu.memory_space<vmem>>) attributes {dimension_semantics = [#tpu.dimension_semantics<parallel>], iteration_bounds = array<i64: 2>, scalar_prefetch = 0 : i64, scratch_operands = 0 : i64, tpu.core_type = #tpu.core_type<tc>, window_params = [{transform_indices = @transform_0, window_bounds = array<i64: 1, 128, 128>}, {transform_indices = @transform_1, window_bounds = array<i64: 1, 128, 16>}, {pipeline_mode = #tpu.pipeline_mode<synchronous>, transform_indices = @transform_2, window_bounds = array<i64: 16, 64>}, {pipeline_mode = #tpu.pipeline_mode<synchronous>, transform_indices = @transform_3, window_bounds = array<i64: 1, 64>}, {pipeline_mode = #tpu.pipeline_mode<synchronous>, transform_indices = @transform_4, window_bounds = array<i64: 64, 64>}, {pipeline_mode = #tpu.pipeline_mode<synchronous>, transform_indices = @transform_5, window_bounds = array<i64: 1, 64>}, {pipeline_mode = #tpu.pipeline_mode<synchronous>, transform_indices = @transform_6, window_bounds = array<i64: 1, 64>}, {transform_indices = @transform_7, window_bounds = array<i64: 1>}, {transform_indices = @transform_8, window_bounds = array<i64: 1, 1, 128>}]} {
    %c0 = arith.constant 0 : index
    %c0_0 = arith.constant 0 : index
    %c0_1 = arith.constant 0 : index
    %0 = vector.load %arg1[%c0, %c0_0, %c0_1] : memref<1x128x128xbf16, #tpu.memory_space<vmem>>, vector<1x128x128xbf16>
    %1 = vector.shape_cast %0 : vector<1x128x128xbf16> to vector<128x128xbf16>
    %c0_2 = arith.constant 0 : index
    %c0_3 = arith.constant 0 : index
    %c0_4 = arith.constant 0 : index
    %2 = vector.load %arg2[%c0_2, %c0_3, %c0_4] : memref<1x128x16xbf16, #tpu.memory_space<vmem>>, vector<1x128x16xbf16>
    %3 = vector.shape_cast %2 : vector<1x128x16xbf16> to vector<128x16xbf16>
    %c0_5 = arith.constant 0 : index
    %c0_6 = arith.constant 0 : index
    %4 = vector.load %arg3[%c0_5, %c0_6] : memref<16x64xbf16, #tpu.memory_space<vmem>>, vector<16x64xbf16>
    %cst = arith.constant dense<0.000000e+00> : vector<128x64xf32>
    %5 = tpu.matmul %3, %4, %cst {dimension_numbers = #tpu.dot_dimension_numbers<[1], [0], [0], [1], [0, 0, 1, 1], [], []>} : vector<128x16xbf16>, vector<16x64xbf16>, vector<128x64xf32> -> vector<128x64xf32>
    %6 = arith.truncf %5 : vector<128x64xf32> to vector<128x64xbf16>
    %cst_7 = arith.constant dense<0.000000e+00> : vector<128x64xf32>
    %7 = tpu.matmul %1, %6, %cst_7 {dimension_numbers = #tpu.dot_dimension_numbers<[1], [0], [0], [1], [0, 0, 1, 1], [], []>} : vector<128x128xbf16>, vector<128x64xbf16>, vector<128x64xf32> -> vector<128x64xf32>
    %c0_8 = arith.constant 0 : index
    %c0_9 = arith.constant 0 : index
    %8 = vector.load %arg4[%c0_8, %c0_9] : memref<1x64xf32, #tpu.memory_space<vmem>>, vector<1x64xf32>
    %9 = vector.broadcast %8 : vector<1x64xf32> to vector<128x64xf32>
    %10 = arith.addf %7, %9 : vector<128x64xf32>
    %cst_10 = arith.constant 0.000000e+00 : f32
    %11 = vector.broadcast %cst_10 : f32 to vector<128x64xf32>
    %12 = arith.maximumf %10, %11 : vector<128x64xf32>
    %13 = arith.truncf %12 : vector<128x64xf32> to vector<128x64xbf16>
    %c0_11 = arith.constant 0 : index
    %c0_12 = arith.constant 0 : index
    %14 = vector.load %arg5[%c0_11, %c0_12] : memref<64x64xbf16, #tpu.memory_space<vmem>>, vector<64x64xbf16>
    %cst_13 = arith.constant dense<0.000000e+00> : vector<128x64xf32>
    %15 = tpu.matmul %13, %14, %cst_13 {dimension_numbers = #tpu.dot_dimension_numbers<[1], [0], [0], [1], [0, 0, 1, 1], [], []>} : vector<128x64xbf16>, vector<64x64xbf16>, vector<128x64xf32> -> vector<128x64xf32>
    %16 = arith.truncf %15 : vector<128x64xf32> to vector<128x64xbf16>
    %cst_14 = arith.constant dense<0.000000e+00> : vector<128x64xf32>
    %17 = tpu.matmul %1, %16, %cst_14 {dimension_numbers = #tpu.dot_dimension_numbers<[1], [0], [0], [1], [0, 0, 1, 1], [], []>} : vector<128x128xbf16>, vector<128x64xbf16>, vector<128x64xf32> -> vector<128x64xf32>
    %c0_15 = arith.constant 0 : index
    %c0_16 = arith.constant 0 : index
    %18 = vector.load %arg6[%c0_15, %c0_16] : memref<1x64xf32, #tpu.memory_space<vmem>>, vector<1x64xf32>
    %19 = vector.broadcast %18 : vector<1x64xf32> to vector<128x64xf32>
    %20 = arith.addf %17, %19 : vector<128x64xf32>
    %cst_17 = arith.constant 0.000000e+00 : f32
    %21 = vector.broadcast %cst_17 : f32 to vector<128x64xf32>
    %22 = arith.maximumf %20, %21 : vector<128x64xf32>
    %23 = tpu.transpose %22, [1, 0] : vector<128x64xf32> -> vector<64x128xf32>
    %24 = arith.truncf %23 : vector<64x128xf32> to vector<64x128xbf16>
    %c0_18 = arith.constant 0 : index
    %c0_19 = arith.constant 0 : index
    %25 = vector.load %arg7[%c0_18, %c0_19] : memref<1x64xbf16, #tpu.memory_space<vmem>>, vector<1x64xbf16>
    %cst_20 = arith.constant dense<0.000000e+00> : vector<1x128xf32>
    %26 = tpu.matmul %25, %24, %cst_20 {dimension_numbers = #tpu.dot_dimension_numbers<[1], [0], [0], [1], [0, 0, 1, 1], [], []>} : vector<1x64xbf16>, vector<64x128xbf16>, vector<1x128xf32> -> vector<1x128xf32>
    %c0_21 = arith.constant 0 : index
    %27 = memref.load %arg8[%c0_21] : memref<1xf32, #tpu.memory_space<smem>>
    %28 = vector.broadcast %27 : f32 to vector<1x128xf32>
    %29 = arith.addf %26, %28 : vector<1x128xf32>
    %c0_22 = arith.constant 0 : index
    %c0_23 = arith.constant 0 : index
    %c0_24 = arith.constant 0 : index
    %30 = vector.load %arg9[%c0_22, %c0_23, %c0_24] : memref<1x1x128xf32, #tpu.memory_space<vmem>>, vector<1x1x128xf32>
    %31 = vector.shape_cast %30 : vector<1x1x128xf32> to vector<1x128xf32>
    %32 = vector.shape_cast %29 : vector<1x128xf32> to vector<1x1x128xf32>
    tpu.vector_store %arg9[%c0_22, %c0_23, %c0_24], %32 {strides = array<i32>} : memref<1x1x128xf32, #tpu.memory_space<vmem>>, vector<1x1x128xf32>,
    return
  }
  func.func @transform_0(%arg0: i32) -> (i32, i32, i32) {
    %c0_i32 = arith.constant 0 : i32
    %c0_i32_0 = arith.constant 0 : i32
    %c0_i32_1 = arith.constant 0 : i32
    return %arg0, %c0_i32, %c0_i32_0 : i32, i32, i32
  }
  func.func @transform_1(%arg0: i32) -> (i32, i32, i32) {
    %c0_i32 = arith.constant 0 : i32
    %c0_i32_0 = arith.constant 0 : i32
    %c0_i32_1 = arith.constant 0 : i32
    return %arg0, %c0_i32, %c0_i32_0 : i32, i32, i32
  }
  func.func @transform_2(%arg0: i32) -> (i32, i32) {
    %c0_i32 = arith.constant 0 : i32
    %c0_i32_0 = arith.constant 0 : i32
    %c0_i32_1 = arith.constant 0 : i32
    return %c0_i32, %c0_i32_0 : i32, i32
  }
  func.func @transform_3(%arg0: i32) -> (i32, i32) {
    %c0_i32 = arith.constant 0 : i32
    %c0_i32_0 = arith.constant 0 : i32
    %c0_i32_1 = arith.constant 0 : i32
    return %c0_i32, %c0_i32_0 : i32, i32
  }
  func.func @transform_4(%arg0: i32) -> (i32, i32) {
    %c0_i32 = arith.constant 0 : i32
    %c0_i32_0 = arith.constant 0 : i32
    %c0_i32_1 = arith.constant 0 : i32
    return %c0_i32, %c0_i32_0 : i32, i32
  }
  func.func @transform_5(%arg0: i32) -> (i32, i32) {
    %c0_i32 = arith.constant 0 : i32
    %c0_i32_0 = arith.constant 0 : i32
    %c0_i32_1 = arith.constant 0 : i32
    return %c0_i32, %c0_i32_0 : i32, i32
  }
  func.func @transform_6(%arg0: i32) -> (i32, i32) {
    %c0_i32 = arith.constant 0 : i32
    %c0_i32_0 = arith.constant 0 : i32
    %c0_i32_1 = arith.constant 0 : i32
    return %c0_i32, %c0_i32_0 : i32, i32
  }
  func.func @transform_7(%arg0: i32) -> i32 {
    %c0_i32 = arith.constant 0 : i32
    %c0_i32_0 = arith.constant 0 : i32
    return %c0_i32 : i32
  }
  func.func @transform_8(%arg0: i32) -> (i32, i32, i32) {
    %c0_i32 = arith.constant 0 : i32
    %c0_i32_0 = arith.constant 0 : i32
    %c0_i32_1 = arith.constant 0 : i32
    return %arg0, %c0_i32, %c0_i32_0 : i32, i32, i32
  }
}

</mosaic_0001>

<bundles_post_ra>
// kernel: gnn_forward_batched.1
= control target key start
LH: loop header
LB: loop body
LE: loop exit
PB: predicated region body
PF: predicated region fallthrough
CT: control target
= control target key end

     0   :  { %s1452_s29 = smov 0   ;;  %s1582_s0 = inlined_call_operand.vmem [shape: bf16[2,128,128], index: 0, kind: input, shape index: {}]   ;;  %s1583_s1 = inlined_call_operand.vmem [shape: bf16[2,128,16], index: 1, kind: input, shape index: {}]   ;;  %s1584_s2 = inlined_call_operand.vmem [shape: bf16[16,64], index: 2, kind: input, shape index: {}]   ;;  %s1585_s3 = inlined_call_operand.vmem [shape: f32[1,64], index: 3, kind: input, shape index: {}]   ;;  %s1586_s4 = inlined_call_operand.vmem [shape: bf16[64,64], index: 4, kind: input, shape index: {}]   ;;  %s1587_s5 = inlined_call_operand.vmem [shape: f32[1,64], index: 5, kind: input, shape index: {}]   ;;  %s1588_s6 = inlined_call_operand.vmem [shape: bf16[1,64], index: 6, kind: input, shape index: {}]   ;;  %s1589_s7 = inlined_call_operand.<no memory space> [shape: f32[1], index: 7, kind: input, shape index: {}]   ;;  %s1590_s8 = inlined_call_operand.vmem [shape: f32[2,1,128], index: 8, kind: output, shape index: {}]  }
   0x1   :  { %13 = sst [smem:[#allocation2]] %s1589_s7 }
   0x2 LB: > { %s1134_s30 = sadd.s32 4294967295, %s1400_s29   ;;  %p1138_p0 = scmp.ge.s32.totalorder %s1400_s29, 1  ;;  %s1400_s29 = sphi %s1452_s29, %s19_s29  }
   0x3   : > { %p273_p1 = scmp.lt.s32.totalorder %s1400_s29, 3 }
   0x5   : > { %p274_p2 = pnand %p1138_p0, %p273_p1 }
   0x6   : > { %v1373_v0 = vld [vmem:[%s1584_s2] sm:$0xff] (!%p274_p2)   ;;  %p310_p3 = scmp.lt.s32.totalorder (!%p274_p2), %s1134_s30, 1  ;;  %vm404_vm0 = vcmask (!%p274_p2), 130048   ;;  %v1391_v11 = vld [vmem:[%s1586_s4 + $0x8] sm:$0xff] (!%p274_p2)   ;;  %v1392_v12 = vld [vmem:[%s1586_s4 + $0x10] sm:$0xff] (!%p274_p2)   ;;  %vm742_vm1 = vcmask (!%p274_p2), 523264  }
   0x7   : > { %277 = sbr.rel (%p274_p2) target bundleno = 1333 (0x535), region = 52  ;;  %1245 = vmatprep.subr.bf16.mxu0 (!%p274_p2), %v1373_v0  ;;  %v1390_v10 = vld [vmem:[%s1586_s4] sm:$0xff] (!%p274_p2)   ;;  %v1393_v44 = vld [vmem:[%s1586_s4 + $0x18] sm:$0xff] (!%p274_p2)   ;;  %vm1403_vm2 = vmmov (!%p274_p2), 0  }
   0x8   : > { %1246 = vmatpush3.bf16.msra.mxu0 (!%p274_p2), %v1373_v0  ;;  %v1160_v45 = vld [vmem:[%s1585_s3] ss:$0 sm:$0xff] (!%p274_p2) }
   0x9   : > { %1295 = vmatprep.subr.bf16.mxu0 (!%p274_p2), %v1390_v10 }
   0xe   : > { %s1592_s30 = smov (!%p310_p3, %s1134_s30), 1 }
   0xf   : > { %s1185_s7 = sshll.u32 %s1592_s30, 6 }
  0x10   : > { %s319_s13 = scalar_lea.vmem %s1583_s1, %s1185_s7  ;;  %s1480_s16 = scalar_lea.vmem %s1582_s0, %s1185_s7 }
  0x11   : > { %v1374_v1 = vld [vmem:[%s319_s13] sm:$0xff]   ;;  %v1375_v2 = vld [vmem:[%s319_s13 + $0x8] sm:$0xff]   ;;  %v1376_v3 = vld [vmem:[%s319_s13 + $0x10] sm:$0xff]   ;;  %s1029_s7 = sld [smem:[#allocation2]] }
  0x12   : > { %1247 = vmatprep.mubr.msk.bf16.mxu0 %vm404_vm0, %v1374_v1  ;;  %v1377_v4 = vld [vmem:[%s319_s13 + $0x18] sm:$0xff]   ;;  %v1378_v5 = vld [vmem:[%s319_s13 + $0x20] sm:$0xff]   ;;  %v1379_v6 = vld [vmem:[%s319_s13 + $0x28] sm:$0xff]  }
  0x13   : > { %1248 = vmatmul.mubr.msk.bf16.vlgmr.msra.gmra.mrb[0].mxu0 %vm404_vm0, %v1375_v2  ;;  %v1380_v7 = vld [vmem:[%s319_s13 + $0x30] sm:$0xff]   ;;  %v1381_v8 = vld [vmem:[%s319_s13 + $0x38] sm:$0xff]   ;;  %v1483_v9 = vld [vmem:[%s1480_s16] sm:$0xff]   ;;  %s322_s13 = scalar_lea.vmem %s1590_s8, %s1592_s30 }
  0x14   : > { %1251 = vmatprep.mubr.msk.bf16.mxu0 %vm404_vm0, %v1376_v3  ;;  %1279 = vmatprep.mubr.bf16.mxu1 %v1483_v9  ;;  %v1496_v37 = vld [vmem:[%s1480_s16 + $0x8] sm:$0xff]   ;;  %v1499_v38 = vld [vmem:[%s1480_s16 + $0x10] sm:$0xff]   ;;  %v1504_v39 = vld [vmem:[%s1480_s16 + $0x18] sm:$0xff]  }
  0x15   : > { %1296 = vmatpush3.bf16.msra.mxu0 %v1390_v10  ;;  %v1507_v40 = vld [vmem:[%s1480_s16 + $0x20] sm:$0xff]   ;;  %v1512_v41 = vld [vmem:[%s1480_s16 + $0x28] sm:$0xff]   ;;  %v1515_v42 = vld [vmem:[%s1480_s16 + $0x30] sm:$0xff]  }
  0x16   : > { %1297 = vmatprep.subr.bf16.mxu0 %v1391_v11  ;;  %v1520_v43 = vld [vmem:[%s1480_s16 + $0x38] sm:$0xff]  }
  0x19   : > { %1298 = vmatpush3.bf16.msra.mxu0 %v1391_v11 }
  0x1a   : > { %1299 = vmatprep.subr.bf16.mxu0 %v1392_v12 }
  0x1b   : > { %1252 = vmatmul.mubr.msk.bf16.gmra.mrb[4].mxu0 %vm404_vm0, %v1377_v4 }
  0x1c   : > { %1255 = vmatprep.mubr.msk.bf16.mxu0 %vm404_vm0, %v1378_v5 }
  0x1d   : > { %1300 = vmatpush3.bf16.msra.mxu0 %v1392_v12 }
  0x1e   : > { %1301 = vmatprep.subr.bf16.mxu0 %v1393_v44 }
  0x21   : > { %1302 = vmatpush3.bf16.msra.mxu0 %v1393_v44 }
  0x23   : > { %1256 = vmatmul.mubr.msk.bf16.gmra.mrb[8].mxu0 %vm404_vm0, %v1379_v6 }
  0x24   : > { %1259 = vmatprep.mubr.msk.bf16.mxu0 %vm404_vm0, %v1380_v7 }
  0x2b   : > { %1260 = vmatmul.mubr.msk.bf16.gmra.mrb[12].mxu0 %vm404_vm0, %v1381_v8 }
  0xe6   : > { %v1249_v13 = vpop.f32.mrb[0].mxu0 }
  0xe7   : > { %v463_v14 = vpop.f32.mrb[1].mxu0 }
  0xe8   : > { %v1250_v15 = vpop.f32.mrb[2].mxu0 }
  0xe9   : > { %v527_v16 = vpack.c.bf16 %v1250_v15, %v1249_v13  ;;  %v466_v17 = vpop.f32.mrb[3].mxu0 }
  0xea   : > { %v526_v18 = vpack.c.bf16 %v466_v17, %v463_v14 }
  0xec   : > { %1263 = vmatprep.subr.bf16.mxu1 %v526_v18 }
  0xed   : > { %1264 = vmatpush3.bf16.msra.mxu1 %v526_v18 }
  0xee   : > { %v1253_v19 = vpop.f32.mrb[4].mxu0  ;;  %1265 = vmatprep.subr.bf16.mxu1 %v527_v16 }
  0xef   : > { %v479_v20 = vpop.f32.mrb[5].mxu0 }
  0xf0   : > { %v1254_v21 = vpop.f32.mrb[6].mxu0 }
  0xf1   : > { %v529_v22 = vpack.c.bf16 %v1254_v21, %v1253_v19  ;;  %v482_v23 = vpop.f32.mrb[7].mxu0  ;;  %1266 = vmatpush3.bf16.msra.mxu1 %v527_v16 }
  0xf2   : > { %v528_v24 = vpack.c.bf16 %v482_v23, %v479_v20 }
  0xf4   : > { %1267 = vmatprep.subr.bf16.mxu1 %v528_v24 }
  0xf5   : > { %1268 = vmatpush3.bf16.msra.mxu1 %v528_v24 }
  0xf6   : > { %v1257_v25 = vpop.f32.mrb[8].mxu0  ;;  %1269 = vmatprep.subr.bf16.mxu1 %v529_v22 }
  0xf7   : > { %v495_v26 = vpop.f32.mrb[9].mxu0 }
  0xf8   : > { %v1258_v27 = vpop.f32.mrb[10].mxu0 }
  0xf9   : > { %v531_v28 = vpack.c.bf16 %v1258_v27, %v1257_v25  ;;  %v498_v29 = vpop.f32.mrb[11].mxu0  ;;  %1270 = vmatpush3.bf16.msra.mxu1 %v529_v22 }
  0xfa   : > { %v530_v30 = vpack.c.bf16 %v498_v29, %v495_v26 }
  0xfc   : > { %1271 = vmatprep.subr.bf16.mxu1 %v530_v30 }
  0xfd   : > { %1272 = vmatpush3.bf16.msra.mxu1 %v530_v30 }
  0xfe   : > { %v1261_v31 = vpop.f32.mrb[12].mxu0  ;;  %1273 = vmatprep.subr.bf16.mxu1 %v531_v28 }
  0xff   : > { %v511_v32 = vpop.f32.mrb[13].mxu0 }
 0x100   : > { %v1262_v33 = vpop.f32.mrb[14].mxu0 }
 0x101   : > { %v533_v34 = vpack.c.bf16 %v1262_v33, %v1261_v31  ;;  %v514_v35 = vpop.f32.mrb[15].mxu0  ;;  %1274 = vmatpush3.bf16.msra.mxu1 %v531_v28 }
 0x102   : > { %v532_v36 = vpack.c.bf16 %v514_v35, %v511_v32 }
 0x104   : > { %1275 = vmatprep.subr.bf16.mxu1 %v532_v36 }
 0x105   : > { %1276 = vmatpush3.bf16.msra.mxu1 %v532_v36 }
 0x106   : > { %1277 = vmatprep.subr.bf16.mxu1 %v533_v34 }
 0x109   : > { %1278 = vmatpush3.bf16.msra.mxu1 %v533_v34 }
 0x10c   : > { %1280 = vmatmul.mubr.bf16.vlgmr.msra.gmra.mrb[0].mxu1 %v1496_v37 }
 0x10d   : > { %1283 = vmatprep.mubr.bf16.mxu1 %v1499_v38 }
 0x114   : > { %1284 = vmatmul.mubr.bf16.gmra.mrb[4].mxu1 %v1504_v39 }
 0x115   : > { %1287 = vmatprep.mubr.bf16.mxu1 %v1507_v40 }
 0x11c   : > { %1288 = vmatmul.mubr.bf16.gmra.mrb[8].mxu1 %v1512_v41 }
 0x11d   : > { %1291 = vmatprep.mubr.bf16.mxu1 %v1515_v42 }
 0x124   : > { %1292 = vmatmul.mubr.bf16.gmra.mrb[12].mxu1 %v1520_v43 }
 0x125   : > { %1335 = vmatprep.mubr.bf16.mxu1 %v1483_v9 }
 0x1df   : > { %v1281_v46 = vpop.f32.mrb[0].mxu1 }
 0x1e0   : > { %v632_v47 = vadd.f32 %v1281_v46, %v1160_v45  ;;  %v623_v48 = vpop.f32.mrb[1].mxu1 }
 0x1e1   : > { %v624_v49 = vadd.f32 %v1160_v45, %v623_v48  ;;  %v1282_v50 = vpop.f32.mrb[2].mxu1 }
 0x1e2   : > { %v635_v51 = vadd.f32 %v1282_v50, %v1160_v45  ;;  %v626_v52 = vpop.f32.mrb[3].mxu1  ;;  %v688_v54 = vmax.f32 %v632_v47, 0.0 }
 0x1e3   : > { %v627_v53 = vadd.f32 %v1160_v45, %v626_v52  ;;  %v686_v56 = vmax.f32 %v624_v49, 0.0 }
 0x1e4   : > { %v689_v55 = vmax.f32 %v635_v51, 0.0 }
 0x1e5   : > { %v687_v57 = vmax.f32 %v627_v53, 0.0 }
 0x1e6   : > { %v703_v58 = vpack.c.bf16 %v689_v55, %v688_v54 }
 0x1e7   : > { %v702_v59 = vpack.c.bf16 %v687_v57, %v686_v56  ;;  %v1285_v60 = vpop.f32.mrb[4].mxu1 }
 0x1e8   : > { %v648_v61 = vadd.f32 %v1285_v60, %v1160_v45  ;;  %v639_v62 = vpop.f32.mrb[5].mxu1 }
 0x1e9   : > { %v640_v63 = vadd.f32 %v1160_v45, %v639_v62  ;;  %v1286_v0 = vpop.f32.mrb[6].mxu1  ;;  %1303 = vmatprep.mubr.msk.bf16.mxu0 %vm742_vm1, %v702_v59 }
 0x1ea   : > { %v651_v1 = vadd.f32 %v1286_v0, %v1160_v45  ;;  %v642_v2 = vpop.f32.mrb[7].mxu1  ;;  %1304 = vmatmul.mubr.msk.bf16.vlgmr.msra.gmra.mrb[16].mxu0 %vm742_vm1, %v703_v58  ;;  %v692_v4 = vmax.f32 %v648_v61, 0.0 }
 0x1eb   : > { %v643_v3 = vadd.f32 %v1160_v45, %v642_v2  ;;  %v690_v6 = vmax.f32 %v640_v63, 0.0 }
 0x1ec   : > { %v693_v5 = vmax.f32 %v651_v1, 0.0 }
 0x1ed   : > { %v691_v7 = vmax.f32 %v643_v3, 0.0 }
 0x1ee   : > { %v705_v8 = vpack.c.bf16 %v693_v5, %v692_v4  ;;  %v1548_v5 = vld [vmem:[%s1587_s5] ss:$0 sm:$0xff] }
 0x1ef   : > { %v704_v9 = vpack.c.bf16 %v691_v7, %v690_v6  ;;  %v1289_v10 = vpop.f32.mrb[8].mxu1 }
 0x1f0   : > { %v664_v11 = vadd.f32 %v1289_v10, %v1160_v45  ;;  %v655_v12 = vpop.f32.mrb[9].mxu1 }
 0x1f1   : > { %v656_v13 = vadd.f32 %v1160_v45, %v655_v12  ;;  %v1290_v14 = vpop.f32.mrb[10].mxu1  ;;  %1307 = vmatprep.mubr.msk.bf16.mxu0 %vm742_vm1, %v704_v9 }
 0x1f2   : > { %v667_v15 = vadd.f32 %v1290_v14, %v1160_v45  ;;  %v658_v16 = vpop.f32.mrb[11].mxu1  ;;  %1308 = vmatmul.mubr.msk.bf16.gmra.mrb[20].mxu0 %vm742_vm1, %v705_v8  ;;  %v696_v18 = vmax.f32 %v664_v11, 0.0  ;;  %v1402_v14 = vmov 0.0  }
 0x1f3   : > { %v659_v17 = vadd.f32 %v1160_v45, %v658_v16  ;;  %v694_v20 = vmax.f32 %v656_v13, 0.0  ;;  %1351 = vmatprep.subr.bf16.mxu0 %v1402_v14 }
 0x1f4   : > { %v697_v19 = vmax.f32 %v667_v15, 0.0 }
 0x1f5   : > { %v695_v21 = vmax.f32 %v659_v17, 0.0 }
 0x1f6   : > { %v707_v22 = vpack.c.bf16 %v697_v19, %v696_v18 }
 0x1f7   : > { %v706_v23 = vpack.c.bf16 %v695_v21, %v694_v20  ;;  %v1293_v24 = vpop.f32.mrb[12].mxu1 }
 0x1f8   : > { %v680_v25 = vadd.f32 %v1293_v24, %v1160_v45  ;;  %v671_v26 = vpop.f32.mrb[13].mxu1 }
 0x1f9   : > { %v672_v27 = vadd.f32 %v1160_v45, %v671_v26  ;;  %v1294_v28 = vpop.f32.mrb[14].mxu1  ;;  %1311 = vmatprep.mubr.msk.bf16.mxu0 %vm742_vm1, %v706_v23 }
 0x1fa   : > { %v683_v29 = vadd.f32 %v1294_v28, %v1160_v45  ;;  %v674_v30 = vpop.f32.mrb[15].mxu1  ;;  %1312 = vmatmul.mubr.msk.bf16.gmra.mrb[24].mxu0 %vm742_vm1, %v707_v22  ;;  %v700_v32 = vmax.f32 %v680_v25, 0.0 }
 0x1fb   : > { %v675_v31 = vadd.f32 %v1160_v45, %v674_v30  ;;  %v698_v34 = vmax.f32 %v672_v27, 0.0 }
 0x1fc   : > { %v701_v33 = vmax.f32 %v683_v29, 0.0 }
 0x1fd   : > { %v699_v35 = vmax.f32 %v675_v31, 0.0 }
 0x1fe   : > { %v709_v36 = vpack.c.bf16 %v701_v33, %v700_v32 }
 0x1ff   : > { %v708_v44 = vpack.c.bf16 %v699_v35, %v698_v34 }
 0x201   : > { %1315 = vmatprep.mubr.msk.bf16.mxu0 %vm742_vm1, %v708_v44 }
 0x202   : > { %1316 = vmatmul.mubr.msk.bf16.gmra.mrb[28].mxu0 %vm742_vm1, %v709_v36 }
 0x203   : > { %1359 = vmatprep.mubr.msk.bf16.mxu0 %vm1403_vm2, %v1402_v14 }
 0x2bd   : > { %v1305_v46 = vpop.f32.mrb[16].mxu0 }
 0x2be   : > { %v801_v47 = vpop.f32.mrb[17].mxu0 }
 0x2bf   : > { %v1306_v48 = vpop.f32.mrb[18].mxu0 }
 0x2c0   : > { %v865_v49 = vpack.c.bf16 %v1306_v48, %v1305_v46  ;;  %v804_v50 = vpop.f32.mrb[19].mxu0 }
 0x2c1   : > { %v864_v51 = vpack.c.bf16 %v804_v50, %v801_v47 }
 0x2c3   : > { %1319 = vmatprep.subr.bf16.mxu1 %v864_v51 }
 0x2c4   : > { %1320 = vmatpush3.bf16.msra.mxu1 %v864_v51 }
 0x2c5   : > { %v1309_v52 = vpop.f32.mrb[20].mxu0  ;;  %1321 = vmatprep.subr.bf16.mxu1 %v865_v49 }
 0x2c6   : > { %v817_v45 = vpop.f32.mrb[21].mxu0 }
 0x2c7   : > { %v1310_v53 = vpop.f32.mrb[22].mxu0 }
 0x2c8   : > { %v867_v54 = vpack.c.bf16 %v1310_v53, %v1309_v52  ;;  %v820_v55 = vpop.f32.mrb[23].mxu0  ;;  %1322 = vmatpush3.bf16.msra.mxu1 %v865_v49 }
 0x2c9   : > { %v866_v56 = vpack.c.bf16 %v820_v55, %v817_v45 }
 0x2cb   : > { %1323 = vmatprep.subr.bf16.mxu1 %v866_v56 }
 0x2cc   : > { %1324 = vmatpush3.bf16.msra.mxu1 %v866_v56 }
 0x2cd   : > { %v1313_v57 = vpop.f32.mrb[24].mxu0  ;;  %1325 = vmatprep.subr.bf16.mxu1 %v867_v54 }
 0x2ce   : > { %v833_v58 = vpop.f32.mrb[25].mxu0 }
 0x2cf   : > { %v1314_v59 = vpop.f32.mrb[26].mxu0 }
 0x2d0   : > { %v869_v60 = vpack.c.bf16 %v1314_v59, %v1313_v57  ;;  %v836_v61 = vpop.f32.mrb[27].mxu0  ;;  %1326 = vmatpush3.bf16.msra.mxu1 %v867_v54 }
 0x2d1   : > { %v868_v62 = vpack.c.bf16 %v836_v61, %v833_v58 }
 0x2d3   : > { %1327 = vmatprep.subr.bf16.mxu1 %v868_v62 }
 0x2d4   : > { %1328 = vmatpush3.bf16.msra.mxu1 %v868_v62 }
 0x2d5   : > { %v1317_v63 = vpop.f32.mrb[28].mxu0  ;;  %1329 = vmatprep.subr.bf16.mxu1 %v869_v60 }
 0x2d6   : > { %v849_v0 = vpop.f32.mrb[29].mxu0 }
 0x2d7   : > { %v1318_v1 = vpop.f32.mrb[30].mxu0 }
 0x2d8   : > { %v871_v2 = vpack.c.bf16 %v1318_v1, %v1317_v63  ;;  %v852_v3 = vpop.f32.mrb[31].mxu0  ;;  %1330 = vmatpush3.bf16.msra.mxu1 %v869_v60 }
 0x2d9   : > { %v870_v4 = vpack.c.bf16 %v852_v3, %v849_v0  ;;  %v1028_v3 = vld [vmem:[%s1588_s6] sm:$0x1] }
 0x2db   : > { %1331 = vmatprep.subr.bf16.mxu1 %v870_v4 }
 0x2dc   : > { %1332 = vmatpush3.bf16.msra.mxu1 %v870_v4  ;;  %v1030_v4 = vstv %s1029_s7 }
 0x2dd   : > { %1333 = vmatprep.subr.bf16.mxu1 %v871_v2 }
 0x2e0   : > { %1334 = vmatpush3.bf16.msra.mxu1 %v871_v2 }
 0x2e3   : > { %1336 = vmatmul.mubr.bf16.vlgmr.msra.gmra.mrb[16].mxu1 %v1496_v37 }
 0x2e4   : > { %1339 = vmatprep.mubr.bf16.mxu1 %v1499_v38 }
 0x2eb   : > { %1340 = vmatmul.mubr.bf16.gmra.mrb[20].mxu1 %v1504_v39 }
 0x2ec   : > { %1343 = vmatprep.mubr.bf16.mxu1 %v1507_v40 }
 0x2f3   : > { %1344 = vmatmul.mubr.bf16.gmra.mrb[24].mxu1 %v1512_v41 }
 0x2f4   : > { %1347 = vmatprep.mubr.bf16.mxu1 %v1515_v42 }
 0x2fb   : > { %1348 = vmatmul.mubr.bf16.gmra.mrb[28].mxu1 %v1520_v43 }
 0x3b6   : > { %v1337_v6 = vpop.f32.mrb[16].mxu1 }
 0x3b7   : > { %v913_v7 = vpop.f32.mrb[17].mxu1  ;;  %v922_v41 = vadd.f32 %v1337_v6, %v1548_v5 }
 0x3b8   : > { %v1338_v37 = vpop.f32.mrb[18].mxu1  ;;  %v914_v38 = vadd.f32 %v1548_v5, %v913_v7 }
 0x3b9   : > { %v916_v8 = vpop.f32.mrb[19].mxu1  ;;  %v978_v12 = vmax.f32 %v922_v41, 0.0  ;;  %v925_v13 = vadd.f32 %v1338_v37, %v1548_v5 }
 0x3ba   : > { %v917_v39 = vadd.f32 %v1548_v5, %v916_v8  ;;  %v976_v40 = vmax.f32 %v914_v38, 0.0 }
 0x3bb   : > { %v979_v16 = vmax.f32 %v925_v13, 0.0 }
 0x3bc   : > { %992 = vxpose.xlu0.b32.start [1/16] (narrow) %v976_v40, 64  ;;  %v977_v42 = vmax.f32 %v917_v39, 0.0 }
 0x3be   : > { %v1341_v9 = vpop.f32.mrb[20].mxu1 }
 0x3bf   : > { %v929_v43 = vpop.f32.mrb[21].mxu1  ;;  %v938_v23 = vadd.f32 %v1341_v9, %v1548_v5 }
 0x3c0   : > { %993 = vxpose.xlu0.b32.cont [2/16] (narrow) %v977_v42, 64  ;;  %v1342_v10 = vpop.f32.mrb[22].mxu1  ;;  %v930_v15 = vadd.f32 %v1548_v5, %v929_v43 }
 0x3c1   : > { %v932_v11 = vpop.f32.mrb[23].mxu1  ;;  %v982_v29 = vmax.f32 %v938_v23, 0.0  ;;  %v941_v30 = vadd.f32 %v1342_v10, %v1548_v5 }
 0x3c2   : > { %v980_v19 = vmax.f32 %v930_v15, 0.0  ;;  %v933_v22 = vadd.f32 %v1548_v5, %v932_v11 }
 0x3c3   : > { %v983_v32 = vmax.f32 %v941_v30, 0.0 }
 0x3c4   : > { %994 = vxpose.xlu0.b32.cont [3/16] (narrow) %v978_v12, 64  ;;  %v981_v24 = vmax.f32 %v933_v22, 0.0 }
 0x3c6   : > { %v1345_v17 = vpop.f32.mrb[24].mxu1 }
 0x3c7   : > { %v945_v18 = vpop.f32.mrb[25].mxu1  ;;  %v954_v35 = vadd.f32 %v1345_v17, %v1548_v5 }
 0x3c8   : > { %995 = vxpose.xlu0.b32.cont [4/16] (narrow) %v979_v16, 64  ;;  %v1346_v20 = vpop.f32.mrb[26].mxu1  ;;  %v946_v31 = vadd.f32 %v1548_v5, %v945_v18 }
 0x3c9   : > { %v948_v21 = vpop.f32.mrb[27].mxu1  ;;  %v986_v44 = vmax.f32 %v954_v35, 0.0  ;;  %v957_v46 = vadd.f32 %v1346_v20, %v1548_v5 }
 0x3ca   : > { %v984_v33 = vmax.f32 %v946_v31, 0.0  ;;  %v949_v34 = vadd.f32 %v1548_v5, %v948_v21 }
 0x3cb   : > { %v987_v48 = vmax.f32 %v957_v46, 0.0 }
 0x3cc   : > { %996 = vxpose.xlu0.b32.cont [5/16] (narrow) %v980_v19, 64  ;;  %v985_v36 = vmax.f32 %v949_v34, 0.0 }
 0x3ce   : > { %v1349_v25 = vpop.f32.mrb[28].mxu1 }
 0x3cf   : > { %v961_v26 = vpop.f32.mrb[29].mxu1  ;;  %v970_v51 = vadd.f32 %v1349_v25, %v1548_v5 }
 0x3d0   : > { %997 = vxpose.xlu0.b32.cont [6/16] (narrow) %v981_v24, 64  ;;  %v1350_v27 = vpop.f32.mrb[30].mxu1  ;;  %v962_v47 = vadd.f32 %v1548_v5, %v961_v26 }
 0x3d1   : > { %v964_v28 = vpop.f32.mrb[31].mxu1  ;;  %v990_v45 = vmax.f32 %v970_v51, 0.0  ;;  %v973_v53 = vadd.f32 %v1350_v27, %v1548_v5 }
 0x3d2   : > { %v988_v49 = vmax.f32 %v962_v47, 0.0  ;;  %v965_v50 = vadd.f32 %v1548_v5, %v964_v28 }
 0x3d3   : > { %v991_v54 = vmax.f32 %v973_v53, 0.0 }
 0x3d4   : > { %998 = vxpose.xlu0.b32.cont [7/16] (narrow) %v982_v29, 64  ;;  %v989_v52 = vmax.f32 %v965_v50, 0.0 }
 0x3d8   : > { %999 = vxpose.xlu0.b32.cont [8/16] (narrow) %v983_v32, 64 }
 0x3dc   : > { %1000 = vxpose.xlu0.b32.cont [9/16] (narrow) %v984_v33, 64 }
 0x3e0   : > { %1001 = vxpose.xlu0.b32.cont [10/16] (narrow) %v985_v36, 64 }
 0x3e4   : > { %1002 = vxpose.xlu0.b32.cont [11/16] (narrow) %v986_v44, 64 }
 0x3e8   : > { %1003 = vxpose.xlu0.b32.cont [12/16] (narrow) %v987_v48, 64 }
 0x3ec   : > { %1004 = vxpose.xlu0.b32.cont [13/16] (narrow) %v988_v49, 64 }
 0x3f0   : > { %1005 = vxpose.xlu0.b32.cont [14/16] (narrow) %v989_v52, 64 }
 0x3f4   : > { %1006 = vxpose.xlu0.b32.cont [15/16] (narrow) %v990_v45, 64 }
 0x3f8   : > { %1007 = vxpose.xlu0.b32.end [16/16] (narrow) %v991_v54, 64 }
 0x43c   : > { %v1008_v55 = vpop.trf.xlu0 }
 0x440   : > { %v1009_v56 = vpop.trf.xlu0 }
 0x441   : > { %v1024_v57 = vpack.c.bf16 %v1009_v56, %v1008_v55 }
 0x443   : > { %1352 = vmatpush3.bf16.msra.mxu0 %v1024_v57 }
 0x444   : > { %v1010_v58 = vpop.trf.xlu0  ;;  %1353 = vmatprep.subr.bf16.mxu0 %v1402_v14 }
 0x448   : > { %v1011_v59 = vpop.trf.xlu0 }
 0x449   : > { %v1025_v60 = vpack.c.bf16 %v1011_v59, %v1010_v58 }
 0x44b   : > { %1354 = vmatpush3.bf16.msra.mxu0 %v1025_v60 }
 0x44c   : > { %v1012_v61 = vpop.trf.xlu0  ;;  %1355 = vmatprep.subr.bf16.mxu0 %v1402_v14 }
 0x450   : > { %v1013_v62 = vpop.trf.xlu0 }
 0x451   : > { %v1026_v63 = vpack.c.bf16 %v1013_v62, %v1012_v61 }
 0x453   : > { %1356 = vmatpush3.bf16.msra.mxu0 %v1026_v63 }
 0x454   : > { %v1014_v0 = vpop.trf.xlu0  ;;  %1357 = vmatprep.subr.bf16.mxu0 %v1402_v14 }
 0x458   : > { %v1015_v1 = vpop.trf.xlu0 }
 0x459   : > { %v1027_v2 = vpack.c.bf16 %v1015_v1, %v1014_v0 }
 0x45b   : > { %1358 = vmatpush3.bf16.msra.mxu0 %v1027_v2 }
 0x45e   : > { %1360 = vmatmul.mubr.msk.bf16.vlgmr.msra.gmra.mrb[32].mxu0 %vm742_vm1, %v1028_v3 }
 0x531   : > { %v1068_v5 = vpop.f32.mrb[32].mxu0 }
 0x532   : > { %v1069_v6 = vadd.f32 %v1068_v5, %v1030_v4  ;;  %v1361_v7 = vpop.f32.mrb[33].mxu0 }
 0x533   : > { %v1071_v37 = vpop.f32.mrb[34].mxu0 }
 0x534   : > { %1074 = vst [vmem:[%s322_s13] sm:$0x1] %v1069_v6  ;;  %v1362_v38 = vpop.f32.mrb[35].mxu0 }
 0x535 PF: > { %s19_s29 = sadd.s32 1, %s1400_s29  }
 0x536   : > { %p16_p4 = scmp.ge.s32.totalorder %s19_s29, 4  }
 0x538   :  { %18 = sbr.rel (!%p16_p4) target bundleno = 2 (0x2), region = 85 }

</bundles_post_ra>
